<compile_context>
chip_gen: v7x
topology: tpu7x:2x2x1
jax: 0.10.0
libtpu: 0.0.40
codegen_flags: <defaults>
</compile_context>

<pallas_src>
import jax
import jax.numpy as jnp
from jax.experimental import pallas as pl
from jax.experimental.pallas import tpu as pltpu


def _upconv_kernel(w_ref, x_ref, b_ref, m_ref, o_ref):
    # w_ref: (CB, Cin)      1x1 conv weight tile, channels-major
    # x_ref: (Cin, TH, W)   TH source rows of one image, NCHW layout
    # b_ref: (CB, 1)        bias tile
    # m_ref: (W, 2W)        constant 0/1 width-duplication matrix
    # o_ref: (CB, TH, 4W)   per source row h: [out row 2h (2W) | out row 2h+1 (2W)]
    _, th, _ = x_ref.shape
    for t in range(th):
        xt = x_ref[:, t, :]                                          # (Cin, W)
        yt = jnp.dot(w_ref[...], xt,
                     preferred_element_type=jnp.float32) + b_ref[...]  # (CB, W)
        # nearest-neighbour width upsample as an MXU matmul with a constant
        # duplication matrix: (CB, W) @ (W, 2W) -> (CB, 2W), lane-interleaved.
        yw = jnp.dot(yt, m_ref[...], preferred_element_type=jnp.float32)
        row = jnp.concatenate([yw, yw], axis=-1)                     # (CB, 4W)
        o_ref[:, t, :] = row.astype(o_ref.dtype)


def _rup(x, m):
    return (x + m - 1) // m * m


def _vmem_capacity_bytes():
    try:
        cap = getattr(pltpu.get_tpu_info(), "vmem_capacity_bytes", None)
        if cap:
            return min(max(int(cap), 64 * 1024 * 1024), 128 * 1024 * 1024)
    except Exception:
        pass
    return 64 * 1024 * 1024   # conservative (v7x per-TensorCore VMEM)


def _pick_cout_block(cout):
    if cout <= 256:
        return cout                       # full extent is always a legal block dim
    for cand in (256, 128, 64, 32, 16, 8):
        if cout % cand == 0:
            return cand
    return cout


def _per_step_vmem_bytes(cin, cb, th, wd, itemsize):
    x_blk = cin * _rup(th, 8) * _rup(wd, 128) * itemsize
    o_blk = cb * _rup(th, 8) * _rup(4 * wd, 128) * itemsize
    w_blk = _rup(cb, 8) * _rup(cin, 128) * itemsize
    b_blk = _rup(cb, 8) * 128 * itemsize
    m_blk = _rup(wd, 8) * _rup(2 * wd, 128) * itemsize
    return 2 * (x_blk + o_blk + w_blk + b_blk + m_blk)   # double-buffered


def _pick_row_block(h, other_steps, cin, cb, wd, itemsize, budget_bytes):
    # Row-tile candidates: multiples of 8 dividing H (Mosaic (8,128) rule on the
    # second-to-last block dim), else the full extent H.
    hi = (min(h, 64) // 8) * 8
    cands = [t for t in range(hi, 7, -8) if h % t == 0] if hi >= 8 else []
    if not cands:
        cands = [h]
    fitting = [t for t in cands
               if _per_step_vmem_bytes(cin, cb, t, wd, itemsize) <= budget_bytes]
    if not fitting:
        fitting = [min(cands)]
    for t in fitting:                      # descending: biggest tile that still
        if other_steps * (h // t) >= 4:    # leaves >= 4 grid steps (v7x 2 TCs +
            return t                       # DMA/compute pipelining)
    return fitting[-1]                     # otherwise maximize step count


def upconv(x_nchw, w, b):
    """Nearest 2x upsample + 1x1 conv (stride 1).

    x_nchw: (N, Cin, H, W); w: (Cin, Cout); b: (Cout,) -> (N, Cout, 2H, 2W).
    """
    n, cin, h, wd = x_nchw.shape
    cout = w.shape[1]
    dtype = x_nchw.dtype

    cap = _vmem_capacity_bytes()
    vmem_limit = int(min(cap - 16 * 1024 * 1024, int(cap * 0.85)))
    budget = cap // 2

    cb = _pick_cout_block(cout)
    th = _pick_row_block(h, n * (cout // cb), cin, cb, wd, dtype.itemsize, budget)

    # Tiny host-side glue only (O(Cin*Cout) / O(W^2)); no image-sized transposes.
    w_t = jnp.asarray(w).T                                   # (Cout, Cin)
    b2 = jnp.asarray(b).reshape(cout, 1)                     # (Cout, 1)
    m0 = (jnp.arange(wd)[:, None] ==
          (jnp.arange(2 * wd)[None, :] // 2)).astype(dtype)  # (W, 2W)

    grid = (n, cout // cb, h // th)

    out = pl.pallas_call(
        _upconv_kernel,
        out_shape=jax.ShapeDtypeStruct((n, cout, h, 4 * wd), dtype),
        grid_spec=pltpu.PrefetchScalarGridSpec(
            num_scalar_prefetch=0,
            grid=grid,
            in_specs=[
                pl.BlockSpec((cb, cin), lambda i, j, r: (j, 0)),
                pl.BlockSpec((None, cin, th, wd), lambda i, j, r: (i, 0, r, 0)),
                pl.BlockSpec((cb, 1), lambda i, j, r: (j, 0)),
                pl.BlockSpec((wd, 2 * wd), lambda i, j, r: (0, 0)),
            ],
            out_specs=pl.BlockSpec((None, cb, th, 4 * wd),
                                   lambda i, j, r: (i, j, r, 0)),
        ),
        compiler_params=pltpu.CompilerParams(
            dimension_semantics=("parallel", "parallel", "parallel"),
            vmem_limit_bytes=vmem_limit,
        ),
    )(w_t, x_nchw, b2, m0)

    # (N, Cout, H, 4W) row-major IS (N, Cout, 2H, 2W): metadata-only reshape,
    # no NHWC<->NCHW transpose and no extra HBM round trip of the 4x output.
    return out.reshape(n, cout, 2 * h, 2 * wd)


if __name__ == "__main__":
    in_channel, out_channel = 4, 8
    N, H, W = 2, 16, 16

    key = jax.random.PRNGKey(0)
    kx, kw, kb = jax.random.split(key, 3)

    # Deterministic params mimicking nn.Conv2d default init (fan_in = Cin*1*1).
    bound = 1.0 / jnp.sqrt(jnp.float32(in_channel))
    w = jax.random.uniform(kw, (in_channel, out_channel), jnp.float32, -bound, bound)
    b = jax.random.uniform(kb, (out_channel,), jnp.float32, -bound, bound)
    x = jax.random.normal(kx, (N, in_channel, H, W), jnp.float32)

    out = upconv(x, w, b)
    out = jax.block_until_ready(out)

    # Pure-JAX reference of the PyTorch forward: nearest 2x upsample, then 1x1 conv.
    x_up = jnp.repeat(jnp.repeat(x, 2, axis=2), 2, axis=3)
    ref = jnp.einsum('nchw,cd->ndhw', x_up, w) + b[None, :, None, None]

    assert out.shape == (N, out_channel, 2 * H, 2 * W), out.shape
    assert jnp.allclose(out, ref, atol=1e-5, rtol=1e-5), float(jnp.max(jnp.abs(out - ref)))
    print("KERNEL_OK")
</pallas_src>

<mosaic_0001>
module attributes {stable_mosaic.version = 11 : i64} {
  func.func @_upconv_kernel(%arg0: i32, %arg1: i32, %arg2: i32, %arg3: memref<8x4xf32, #tpu.memory_space<vmem>>, %arg4: memref<1x4x8x16xf32, #tpu.memory_space<vmem>>, %arg5: memref<8x1xf32, #tpu.memory_space<vmem>>, %arg6: memref<16x32xf32, #tpu.memory_space<vmem>>, %arg7: memref<1x8x8x64xf32, #tpu.memory_space<vmem>>) attributes {dimension_semantics = [#tpu.dimension_semantics<parallel>, #tpu.dimension_semantics<parallel>, #tpu.dimension_semantics<parallel>], iteration_bounds = array<i64: 2, 1, 2>, scalar_prefetch = 0 : i64, scratch_operands = 0 : i64, tpu.core_type = #tpu.core_type<tc>, window_params = [{transform_indices = @transform_0, window_bounds = array<i64: 8, 4>}, {transform_indices = @transform_1, window_bounds = array<i64: 1, 4, 8, 16>}, {transform_indices = @transform_2, window_bounds = array<i64: 8, 1>}, {pipeline_mode = #tpu.pipeline_mode<synchronous>, transform_indices = @transform_3, window_bounds = array<i64: 16, 32>}, {transform_indices = @transform_4, window_bounds = array<i64: 1, 8, 8, 64>}]} {
    %c0 = arith.constant 0 : index
    %c0_0 = arith.constant 0 : index
    %c0_1 = arith.constant 0 : index
    %c0_2 = arith.constant 0 : index
    %0 = vector.load %arg4[%c0, %c0_0, %c0_1, %c0_2] : memref<1x4x8x16xf32, #tpu.memory_space<vmem>>, vector<1x4x1x16xf32>
    %1 = vector.shape_cast %0 : vector<1x4x1x16xf32> to vector<4x16xf32>
    %c0_3 = arith.constant 0 : index
    %c0_4 = arith.constant 0 : index
    %2 = vector.load %arg3[%c0_3, %c0_4] : memref<8x4xf32, #tpu.memory_space<vmem>>, vector<8x4xf32>
    %cst = arith.constant dense<0.000000e+00> : vector<8x16xf32>
    %3 = tpu.matmul %2, %1, %cst {dimension_numbers = #tpu.dot_dimension_numbers<[1], [0], [0], [1], [0, 0, 1, 1], [], []>} : vector<8x4xf32>, vector<4x16xf32>, vector<8x16xf32> -> vector<8x16xf32>
    %c0_5 = arith.constant 0 : index
    %c0_6 = arith.constant 0 : index
    %4 = vector.load %arg5[%c0_5, %c0_6] : memref<8x1xf32, #tpu.memory_space<vmem>>, vector<8x1xf32>
    %5 = vector.broadcast %4 : vector<8x1xf32> to vector<8x16xf32>
    %6 = arith.addf %3, %5 : vector<8x16xf32>
    %c0_7 = arith.constant 0 : index
    %c0_8 = arith.constant 0 : index
    %7 = vector.load %arg6[%c0_7, %c0_8] : memref<16x32xf32, #tpu.memory_space<vmem>>, vector<16x32xf32>
    %cst_9 = arith.constant dense<0.000000e+00> : vector<8x32xf32>
    %8 = tpu.matmul %6, %7, %cst_9 {dimension_numbers = #tpu.dot_dimension_numbers<[1], [0], [0], [1], [0, 0, 1, 1], [], []>} : vector<8x16xf32>, vector<16x32xf32>, vector<8x32xf32> -> vector<8x32xf32>
    %9 = tpu.concatenate %8, %8 in 1 : vector<8x32xf32>, vector<8x32xf32> -> vector<8x64xf32>
    %c0_10 = arith.constant 0 : index
    %c0_11 = arith.constant 0 : index
    %c0_12 = arith.constant 0 : index
    %c0_13 = arith.constant 0 : index
    %10 = vector.load %arg7[%c0_10, %c0_11, %c0_12, %c0_13] : memref<1x8x8x64xf32, #tpu.memory_space<vmem>>, vector<1x8x1x64xf32>
    %11 = vector.shape_cast %10 : vector<1x8x1x64xf32> to vector<8x64xf32>
    %12 = vector.shape_cast %9 : vector<8x64xf32> to vector<1x8x1x64xf32>
    tpu.vector_store %arg7[%c0_10, %c0_11, %c0_12, %c0_13], %12 {strides = array<i32>} : memref<1x8x8x64xf32, #tpu.memory_space<vmem>>, vector<1x8x1x64xf32>,
    %c0_14 = arith.constant 0 : index
    %c0_15 = arith.constant 0 : index
    %c1 = arith.constant 1 : index
    %c0_16 = arith.constant 0 : index
    %13 = vector.load %arg4[%c0_14, %c0_15, %c1, %c0_16] : memref<1x4x8x16xf32, #tpu.memory_space<vmem>>, vector<1x4x1x16xf32>
    %14 = vector.shape_cast %13 : vector<1x4x1x16xf32> to vector<4x16xf32>
    %c0_17 = arith.constant 0 : index
    %c0_18 = arith.constant 0 : index
    %15 = vector.load %arg3[%c0_17, %c0_18] : memref<8x4xf32, #tpu.memory_space<vmem>>, vector<8x4xf32>
    %cst_19 = arith.constant dense<0.000000e+00> : vector<8x16xf32>
    %16 = tpu.matmul %15, %14, %cst_19 {dimension_numbers = #tpu.dot_dimension_numbers<[1], [0], [0], [1], [0, 0, 1, 1], [], []>} : vector<8x4xf32>, vector<4x16xf32>, vector<8x16xf32> -> vector<8x16xf32>
    %c0_20 = arith.constant 0 : index
    %c0_21 = arith.constant 0 : index
    %17 = vector.load %arg5[%c0_20, %c0_21] : memref<8x1xf32, #tpu.memory_space<vmem>>, vector<8x1xf32>
    %18 = vector.broadcast %17 : vector<8x1xf32> to vector<8x16xf32>
    %19 = arith.addf %16, %18 : vector<8x16xf32>
    %c0_22 = arith.constant 0 : index
    %c0_23 = arith.constant 0 : index
    %20 = vector.load %arg6[%c0_22, %c0_23] : memref<16x32xf32, #tpu.memory_space<vmem>>, vector<16x32xf32>
    %cst_24 = arith.constant dense<0.000000e+00> : vector<8x32xf32>
    %21 = tpu.matmul %19, %20, %cst_24 {dimension_numbers = #tpu.dot_dimension_numbers<[1], [0], [0], [1], [0, 0, 1, 1], [], []>} : vector<8x16xf32>, vector<16x32xf32>, vector<8x32xf32> -> vector<8x32xf32>
    %22 = tpu.concatenate %21, %21 in 1 : vector<8x32xf32>, vector<8x32xf32> -> vector<8x64xf32>
    %c0_25 = arith.constant 0 : index
    %c0_26 = arith.constant 0 : index
    %c1_27 = arith.constant 1 : index
    %c0_28 = arith.constant 0 : index
    %23 = vector.load %arg7[%c0_25, %c0_26, %c1_27, %c0_28] : memref<1x8x8x64xf32, #tpu.memory_space<vmem>>, vector<1x8x1x64xf32>
    %24 = vector.shape_cast %23 : vector<1x8x1x64xf32> to vector<8x64xf32>
    %25 = vector.shape_cast %22 : vector<8x64xf32> to vector<1x8x1x64xf32>
    tpu.vector_store %arg7[%c0_25, %c0_26, %c1_27, %c0_28], %25 {strides = array<i32>} : memref<1x8x8x64xf32, #tpu.memory_space<vmem>>, vector<1x8x1x64xf32>,
    %c0_29 = arith.constant 0 : index
    %c0_30 = arith.constant 0 : index
    %c2 = arith.constant 2 : index
    %c0_31 = arith.constant 0 : index
    %26 = vector.load %arg4[%c0_29, %c0_30, %c2, %c0_31] : memref<1x4x8x16xf32, #tpu.memory_space<vmem>>, vector<1x4x1x16xf32>
    %27 = vector.shape_cast %26 : vector<1x4x1x16xf32> to vector<4x16xf32>
    %c0_32 = arith.constant 0 : index
    %c0_33 = arith.constant 0 : index
    %28 = vector.load %arg3[%c0_32, %c0_33] : memref<8x4xf32, #tpu.memory_space<vmem>>, vector<8x4xf32>
    %cst_34 = arith.constant dense<0.000000e+00> : vector<8x16xf32>
    %29 = tpu.matmul %28, %27, %cst_34 {dimension_numbers = #tpu.dot_dimension_numbers<[1], [0], [0], [1], [0, 0, 1, 1], [], []>} : vector<8x4xf32>, vector<4x16xf32>, vector<8x16xf32> -> vector<8x16xf32>
    %c0_35 = arith.constant 0 : index
    %c0_36 = arith.constant 0 : index
    %30 = vector.load %arg5[%c0_35, %c0_36] : memref<8x1xf32, #tpu.memory_space<vmem>>, vector<8x1xf32>
    %31 = vector.broadcast %30 : vector<8x1xf32> to vector<8x16xf32>
    %32 = arith.addf %29, %31 : vector<8x16xf32>
    %c0_37 = arith.constant 0 : index
    %c0_38 = arith.constant 0 : index
    %33 = vector.load %arg6[%c0_37, %c0_38] : memref<16x32xf32, #tpu.memory_space<vmem>>, vector<16x32xf32>
    %cst_39 = arith.constant dense<0.000000e+00> : vector<8x32xf32>
    %34 = tpu.matmul %32, %33, %cst_39 {dimension_numbers = #tpu.dot_dimension_numbers<[1], [0], [0], [1], [0, 0, 1, 1], [], []>} : vector<8x16xf32>, vector<16x32xf32>, vector<8x32xf32> -> vector<8x32xf32>
    %35 = tpu.concatenate %34, %34 in 1 : vector<8x32xf32>, vector<8x32xf32> -> vector<8x64xf32>
    %c0_40 = arith.constant 0 : index
    %c0_41 = arith.constant 0 : index
    %c2_42 = arith.constant 2 : index
    %c0_43 = arith.constant 0 : index
    %36 = vector.load %arg7[%c0_40, %c0_41, %c2_42, %c0_43] : memref<1x8x8x64xf32, #tpu.memory_space<vmem>>, vector<1x8x1x64xf32>
    %37 = vector.shape_cast %36 : vector<1x8x1x64xf32> to vector<8x64xf32>
    %38 = vector.shape_cast %35 : vector<8x64xf32> to vector<1x8x1x64xf32>
    tpu.vector_store %arg7[%c0_40, %c0_41, %c2_42, %c0_43], %38 {strides = array<i32>} : memref<1x8x8x64xf32, #tpu.memory_space<vmem>>, vector<1x8x1x64xf32>,
    %c0_44 = arith.constant 0 : index
    %c0_45 = arith.constant 0 : index
    %c3 = arith.constant 3 : index
    %c0_46 = arith.constant 0 : index
    %39 = vector.load %arg4[%c0_44, %c0_45, %c3, %c0_46] : memref<1x4x8x16xf32, #tpu.memory_space<vmem>>, vector<1x4x1x16xf32>
    %40 = vector.shape_cast %39 : vector<1x4x1x16xf32> to vector<4x16xf32>
    %c0_47 = arith.constant 0 : index
    %c0_48 = arith.constant 0 : index
    %41 = vector.load %arg3[%c0_47, %c0_48] : memref<8x4xf32, #tpu.memory_space<vmem>>, vector<8x4xf32>
    %cst_49 = arith.constant dense<0.000000e+00> : vector<8x16xf32>
    %42 = tpu.matmul %41, %40, %cst_49 {dimension_numbers = #tpu.dot_dimension_numbers<[1], [0], [0], [1], [0, 0, 1, 1], [], []>} : vector<8x4xf32>, vector<4x16xf32>, vector<8x16xf32> -> vector<8x16xf32>
    %c0_50 = arith.constant 0 : index
    %c0_51 = arith.constant 0 : index
    %43 = vector.load %arg5[%c0_50, %c0_51] : memref<8x1xf32, #tpu.memory_space<vmem>>, vector<8x1xf32>
    %44 = vector.broadcast %43 : vector<8x1xf32> to vector<8x16xf32>
    %45 = arith.addf %42, %44 : vector<8x16xf32>
    %c0_52 = arith.constant 0 : index
    %c0_53 = arith.constant 0 : index
    %46 = vector.load %arg6[%c0_52, %c0_53] : memref<16x32xf32, #tpu.memory_space<vmem>>, vector<16x32xf32>
    %cst_54 = arith.constant dense<0.000000e+00> : vector<8x32xf32>
    %47 = tpu.matmul %45, %46, %cst_54 {dimension_numbers = #tpu.dot_dimension_numbers<[1], [0], [0], [1], [0, 0, 1, 1], [], []>} : vector<8x16xf32>, vector<16x32xf32>, vector<8x32xf32> -> vector<8x32xf32>
    %48 = tpu.concatenate %47, %47 in 1 : vector<8x32xf32>, vector<8x32xf32> -> vector<8x64xf32>
    %c0_55 = arith.constant 0 : index
    %c0_56 = arith.constant 0 : index
    %c3_57 = arith.constant 3 : index
    %c0_58 = arith.constant 0 : index
    %49 = vector.load %arg7[%c0_55, %c0_56, %c3_57, %c0_58] : memref<1x8x8x64xf32, #tpu.memory_space<vmem>>, vector<1x8x1x64xf32>
    %50 = vector.shape_cast %49 : vector<1x8x1x64xf32> to vector<8x64xf32>
    %51 = vector.shape_cast %48 : vector<8x64xf32> to vector<1x8x1x64xf32>
    tpu.vector_store %arg7[%c0_55, %c0_56, %c3_57, %c0_58], %51 {strides = array<i32>} : memref<1x8x8x64xf32, #tpu.memory_space<vmem>>, vector<1x8x1x64xf32>,
    %c0_59 = arith.constant 0 : index
    %c0_60 = arith.constant 0 : index
    %c4 = arith.constant 4 : index
    %c0_61 = arith.constant 0 : index
    %52 = vector.load %arg4[%c0_59, %c0_60, %c4, %c0_61] : memref<1x4x8x16xf32, #tpu.memory_space<vmem>>, vector<1x4x1x16xf32>
    %53 = vector.shape_cast %52 : vector<1x4x1x16xf32> to vector<4x16xf32>
    %c0_62 = arith.constant 0 : index
    %c0_63 = arith.constant 0 : index
    %54 = vector.load %arg3[%c0_62, %c0_63] : memref<8x4xf32, #tpu.memory_space<vmem>>, vector<8x4xf32>
    %cst_64 = arith.constant dense<0.000000e+00> : vector<8x16xf32>
    %55 = tpu.matmul %54, %53, %cst_64 {dimension_numbers = #tpu.dot_dimension_numbers<[1], [0], [0], [1], [0, 0, 1, 1], [], []>} : vector<8x4xf32>, vector<4x16xf32>, vector<8x16xf32> -> vector<8x16xf32>
    %c0_65 = arith.constant 0 : index
    %c0_66 = arith.constant 0 : index
    %56 = vector.load %arg5[%c0_65, %c0_66] : memref<8x1xf32, #tpu.memory_space<vmem>>, vector<8x1xf32>
    %57 = vector.broadcast %56 : vector<8x1xf32> to vector<8x16xf32>
    %58 = arith.addf %55, %57 : vector<8x16xf32>
    %c0_67 = arith.constant 0 : index
    %c0_68 = arith.constant 0 : index
    %59 = vector.load %arg6[%c0_67, %c0_68] : memref<16x32xf32, #tpu.memory_space<vmem>>, vector<16x32xf32>
    %cst_69 = arith.constant dense<0.000000e+00> : vector<8x32xf32>
    %60 = tpu.matmul %58, %59, %cst_69 {dimension_numbers = #tpu.dot_dimension_numbers<[1], [0], [0], [1], [0, 0, 1, 1], [], []>} : vector<8x16xf32>, vector<16x32xf32>, vector<8x32xf32> -> vector<8x32xf32>
    %61 = tpu.concatenate %60, %60 in 1 : vector<8x32xf32>, vector<8x32xf32> -> vector<8x64xf32>
    %c0_70 = arith.constant 0 : index
    %c0_71 = arith.constant 0 : index
    %c4_72 = arith.constant 4 : index
    %c0_73 = arith.constant 0 : index
    %62 = vector.load %arg7[%c0_70, %c0_71, %c4_72, %c0_73] : memref<1x8x8x64xf32, #tpu.memory_space<vmem>>, vector<1x8x1x64xf32>
    %63 = vector.shape_cast %62 : vector<1x8x1x64xf32> to vector<8x64xf32>
    %64 = vector.shape_cast %61 : vector<8x64xf32> to vector<1x8x1x64xf32>
    tpu.vector_store %arg7[%c0_70, %c0_71, %c4_72, %c0_73], %64 {strides = array<i32>} : memref<1x8x8x64xf32, #tpu.memory_space<vmem>>, vector<1x8x1x64xf32>,
    %c0_74 = arith.constant 0 : index
    %c0_75 = arith.constant 0 : index
    %c5 = arith.constant 5 : index
    %c0_76 = arith.constant 0 : index
    %65 = vector.load %arg4[%c0_74, %c0_75, %c5, %c0_76] : memref<1x4x8x16xf32, #tpu.memory_space<vmem>>, vector<1x4x1x16xf32>
    %66 = vector.shape_cast %65 : vector<1x4x1x16xf32> to vector<4x16xf32>
    %c0_77 = arith.constant 0 : index
    %c0_78 = arith.constant 0 : index
    %67 = vector.load %arg3[%c0_77, %c0_78] : memref<8x4xf32, #tpu.memory_space<vmem>>, vector<8x4xf32>
    %cst_79 = arith.constant dense<0.000000e+00> : vector<8x16xf32>
    %68 = tpu.matmul %67, %66, %cst_79 {dimension_numbers = #tpu.dot_dimension_numbers<[1], [0], [0], [1], [0, 0, 1, 1], [], []>} : vector<8x4xf32>, vector<4x16xf32>, vector<8x16xf32> -> vector<8x16xf32>
    %c0_80 = arith.constant 0 : index
    %c0_81 = arith.constant 0 : index
    %69 = vector.load %arg5[%c0_80, %c0_81] : memref<8x1xf32, #tpu.memory_space<vmem>>, vector<8x1xf32>
    %70 = vector.broadcast %69 : vector<8x1xf32> to vector<8x16xf32>
    %71 = arith.addf %68, %70 : vector<8x16xf32>
    %c0_82 = arith.constant 0 : index
    %c0_83 = arith.constant 0 : index
    %72 = vector.load %arg6[%c0_82, %c0_83] : memref<16x32xf32, #tpu.memory_space<vmem>>, vector<16x32xf32>
    %cst_84 = arith.constant dense<0.000000e+00> : vector<8x32xf32>
    %73 = tpu.matmul %71, %72, %cst_84 {dimension_numbers = #tpu.dot_dimension_numbers<[1], [0], [0], [1], [0, 0, 1, 1], [], []>} : vector<8x16xf32>, vector<16x32xf32>, vector<8x32xf32> -> vector<8x32xf32>
    %74 = tpu.concatenate %73, %73 in 1 : vector<8x32xf32>, vector<8x32xf32> -> vector<8x64xf32>
    %c0_85 = arith.constant 0 : index
    %c0_86 = arith.constant 0 : index
    %c5_87 = arith.constant 5 : index
    %c0_88 = arith.constant 0 : index
    %75 = vector.load %arg7[%c0_85, %c0_86, %c5_87, %c0_88] : memref<1x8x8x64xf32, #tpu.memory_space<vmem>>, vector<1x8x1x64xf32>
    %76 = vector.shape_cast %75 : vector<1x8x1x64xf32> to vector<8x64xf32>
    %77 = vector.shape_cast %74 : vector<8x64xf32> to vector<1x8x1x64xf32>
    tpu.vector_store %arg7[%c0_85, %c0_86, %c5_87, %c0_88], %77 {strides = array<i32>} : memref<1x8x8x64xf32, #tpu.memory_space<vmem>>, vector<1x8x1x64xf32>,
    %c0_89 = arith.constant 0 : index
    %c0_90 = arith.constant 0 : index
    %c6 = arith.constant 6 : index
    %c0_91 = arith.constant 0 : index
    %78 = vector.load %arg4[%c0_89, %c0_90, %c6, %c0_91] : memref<1x4x8x16xf32, #tpu.memory_space<vmem>>, vector<1x4x1x16xf32>
    %79 = vector.shape_cast %78 : vector<1x4x1x16xf32> to vector<4x16xf32>
    %c0_92 = arith.constant 0 : index
    %c0_93 = arith.constant 0 : index
    %80 = vector.load %arg3[%c0_92, %c0_93] : memref<8x4xf32, #tpu.memory_space<vmem>>, vector<8x4xf32>
    %cst_94 = arith.constant dense<0.000000e+00> : vector<8x16xf32>
    %81 = tpu.matmul %80, %79, %cst_94 {dimension_numbers = #tpu.dot_dimension_numbers<[1], [0], [0], [1], [0, 0, 1, 1], [], []>} : vector<8x4xf32>, vector<4x16xf32>, vector<8x16xf32> -> vector<8x16xf32>
    %c0_95 = arith.constant 0 : index
    %c0_96 = arith.constant 0 : index
    %82 = vector.load %arg5[%c0_95, %c0_96] : memref<8x1xf32, #tpu.memory_space<vmem>>, vector<8x1xf32>
    %83 = vector.broadcast %82 : vector<8x1xf32> to vector<8x16xf32>
    %84 = arith.addf %81, %83 : vector<8x16xf32>
    %c0_97 = arith.constant 0 : index
    %c0_98 = arith.constant 0 : index
    %85 = vector.load %arg6[%c0_97, %c0_98] : memref<16x32xf32, #tpu.memory_space<vmem>>, vector<16x32xf32>
    %cst_99 = arith.constant dense<0.000000e+00> : vector<8x32xf32>
    %86 = tpu.matmul %84, %85, %cst_99 {dimension_numbers = #tpu.dot_dimension_numbers<[1], [0], [0], [1], [0, 0, 1, 1], [], []>} : vector<8x16xf32>, vector<16x32xf32>, vector<8x32xf32> -> vector<8x32xf32>
    %87 = tpu.concatenate %86, %86 in 1 : vector<8x32xf32>, vector<8x32xf32> -> vector<8x64xf32>
    %c0_100 = arith.constant 0 : index
    %c0_101 = arith.constant 0 : index
    %c6_102 = arith.constant 6 : index
    %c0_103 = arith.constant 0 : index
    %88 = vector.load %arg7[%c0_100, %c0_101, %c6_102, %c0_103] : memref<1x8x8x64xf32, #tpu.memory_space<vmem>>, vector<1x8x1x64xf32>
    %89 = vector.shape_cast %88 : vector<1x8x1x64xf32> to vector<8x64xf32>
    %90 = vector.shape_cast %87 : vector<8x64xf32> to vector<1x8x1x64xf32>
    tpu.vector_store %arg7[%c0_100, %c0_101, %c6_102, %c0_103], %90 {strides = array<i32>} : memref<1x8x8x64xf32, #tpu.memory_space<vmem>>, vector<1x8x1x64xf32>,
    %c0_104 = arith.constant 0 : index
    %c0_105 = arith.constant 0 : index
    %c7 = arith.constant 7 : index
    %c0_106 = arith.constant 0 : index
    %91 = vector.load %arg4[%c0_104, %c0_105, %c7, %c0_106] : memref<1x4x8x16xf32, #tpu.memory_space<vmem>>, vector<1x4x1x16xf32>
    %92 = vector.shape_cast %91 : vector<1x4x1x16xf32> to vector<4x16xf32>
    %c0_107 = arith.constant 0 : index
    %c0_108 = arith.constant 0 : index
    %93 = vector.load %arg3[%c0_107, %c0_108] : memref<8x4xf32, #tpu.memory_space<vmem>>, vector<8x4xf32>
    %cst_109 = arith.constant dense<0.000000e+00> : vector<8x16xf32>
    %94 = tpu.matmul %93, %92, %cst_109 {dimension_numbers = #tpu.dot_dimension_numbers<[1], [0], [0], [1], [0, 0, 1, 1], [], []>} : vector<8x4xf32>, vector<4x16xf32>, vector<8x16xf32> -> vector<8x16xf32>
    %c0_110 = arith.constant 0 : index
    %c0_111 = arith.constant 0 : index
    %95 = vector.load %arg5[%c0_110, %c0_111] : memref<8x1xf32, #tpu.memory_space<vmem>>, vector<8x1xf32>
    %96 = vector.broadcast %95 : vector<8x1xf32> to vector<8x16xf32>
    %97 = arith.addf %94, %96 : vector<8x16xf32>
    %c0_112 = arith.constant 0 : index
    %c0_113 = arith.constant 0 : index
    %98 = vector.load %arg6[%c0_112, %c0_113] : memref<16x32xf32, #tpu.memory_space<vmem>>, vector<16x32xf32>
    %cst_114 = arith.constant dense<0.000000e+00> : vector<8x32xf32>
    %99 = tpu.matmul %97, %98, %cst_114 {dimension_numbers = #tpu.dot_dimension_numbers<[1], [0], [0], [1], [0, 0, 1, 1], [], []>} : vector<8x16xf32>, vector<16x32xf32>, vector<8x32xf32> -> vector<8x32xf32>
    %100 = tpu.concatenate %99, %99 in 1 : vector<8x32xf32>, vector<8x32xf32> -> vector<8x64xf32>
    %c0_115 = arith.constant 0 : index
    %c0_116 = arith.constant 0 : index
    %c7_117 = arith.constant 7 : index
    %c0_118 = arith.constant 0 : index
    %101 = vector.load %arg7[%c0_115, %c0_116, %c7_117, %c0_118] : memref<1x8x8x64xf32, #tpu.memory_space<vmem>>, vector<1x8x1x64xf32>
    %102 = vector.shape_cast %101 : vector<1x8x1x64xf32> to vector<8x64xf32>
    %103 = vector.shape_cast %100 : vector<8x64xf32> to vector<1x8x1x64xf32>
    tpu.vector_store %arg7[%c0_115, %c0_116, %c7_117, %c0_118], %103 {strides = array<i32>} : memref<1x8x8x64xf32, #tpu.memory_space<vmem>>, vector<1x8x1x64xf32>,
    return
  }
  func.func @transform_0(%arg0: i32, %arg1: i32, %arg2: i32) -> (i32, i32) {
    %c0_i32 = arith.constant 0 : i32
    %c0_i32_0 = arith.constant 0 : i32
    return %arg1, %c0_i32 : i32, i32
  }
  func.func @transform_1(%arg0: i32, %arg1: i32, %arg2: i32) -> (i32, i32, i32, i32) {
    %c0_i32 = arith.constant 0 : i32
    %c0_i32_0 = arith.constant 0 : i32
    %c0_i32_1 = arith.constant 0 : i32
    return %arg0, %c0_i32, %arg2, %c0_i32_0 : i32, i32, i32, i32
  }
  func.func @transform_2(%arg0: i32, %arg1: i32, %arg2: i32) -> (i32, i32) {
    %c0_i32 = arith.constant 0 : i32
    %c0_i32_0 = arith.constant 0 : i32
    return %arg1, %c0_i32 : i32, i32
  }
  func.func @transform_3(%arg0: i32, %arg1: i32, %arg2: i32) -> (i32, i32) {
    %c0_i32 = arith.constant 0 : i32
    %c0_i32_0 = arith.constant 0 : i32
    %c0_i32_1 = arith.constant 0 : i32
    return %c0_i32, %c0_i32_0 : i32, i32
  }
  func.func @transform_4(%arg0: i32, %arg1: i32, %arg2: i32) -> (i32, i32, i32, i32) {
    %c0_i32 = arith.constant 0 : i32
    %c0_i32_0 = arith.constant 0 : i32
    return %arg0, %arg1, %arg2, %c0_i32 : i32, i32, i32, i32
  }
}

</mosaic_0001>

<bundles_post_ra>
// kernel: tpu_custom_call.1
= control target key start
LH: loop header
LB: loop body
LE: loop exit
PB: predicated region body
PF: predicated region fallthrough
CT: control target
= control target key end

     0   :  { %9 = vsyncpa [#allocation3], 0  ;;  %s3394_s0 = inlined_call_operand.vmem [shape: f32[8,4], index: 0, kind: input, shape index: {}]   ;;  %s3395_s1 = inlined_call_operand.hbm [shape: f32[2,4,16,16], index: 1, kind: input, shape index: {}]   ;;  %s3396_s2 = inlined_call_operand.vmem [shape: f32[8,1], index: 2, kind: input, shape index: {}]   ;;  %s3397_s3 = inlined_call_operand.vmem [shape: f32[16,32], index: 3, kind: input, shape index: {}]   ;;  %s3398_s4 = inlined_call_operand.hbm [shape: f32[2,8,16,64], index: 4, kind: output, shape index: {}]  }
   0x1   :  { %11 = vsyncpa [#allocation3 + $0x1], 0 }
   0x2   :  { %12 = vsyncpa [#allocation4], 0 }
   0x3   :  { %14 = vsyncpa [#allocation4 + $0x1], 0  ;;  %s2824_s15 = smov 0   ;;  %s2826_s16 = smov 0  }
   0x4   :  { %s2828_s17 = smov 0   ;;  %s2830_s18 = smov 0  }
   0x5   :  { %s2832_s19 = smov 0   ;;  %s2834_s20 = smov 0  }
   0x6   :  { %s2836_s21 = smov 0   ;;  %s2838_s22 = smov 0  }
   0x7 LB: > { %s2362_s23 = sadd.s32 4294967295, %s2783_s22   ;;  %s2363_s24 = sadd.s32 4294967294, %s2783_s22   ;;  %s2783_s22 = sphi %s2838_s22, %s20_s22   ;;  %s2779_s21 = sphi %s2836_s21, %s3419_s21   ;;  %s2775_s20 = sphi %s2834_s20, %s3418_s20   ;;  %s2771_s19 = sphi %s2832_s19, %s3417_s19   ;;  %s2767_s18 = sphi %s2830_s18, %s3416_s18   ;;  %s2763_s17 = sphi %s2828_s17, %s3415_s17   ;;  %s2759_s16 = sphi %s2826_s16, %s3414_s16   ;;  %s2755_s15 = sphi %s2824_s15, %s3413_s15  }
   0x8   : > { %s32_s25 = sadd.s32 1, %s2775_s20  ;;  %s39_s26 = sadd.s32 1, %s2779_s21 }
   0x9   : > { %p33_p0 = scmp.ge.s32.totalorder %s32_s25, 2  ;;  %s74_s27 = sadd.s32 1, %s2763_s17 }
   0xa   : > { %p81_p1 = scmp.ne.s32.totalorder %s2763_s17, %s2759_s16  ;;  %p82_p2 = scmp.eq.s32.totalorder %s2783_s22, 0 }
   0xb   : > { %s3421_s25 = smov (%p33_p0, %s32_s25), 0  ;;  %s3423_s26 = smov (!%p33_p0, %s39_s26), %s2779_s21 }
   0xc   : > { %3402 = sst [smem:[#allocation8_spill]] %s3421_s25  ;;  %s70_s28 = ssub.s32 %s2775_s20, %s3421_s25 }
   0xd   : > { %p2877_p3 = por %p82_p2, %p81_p1  ;;  %p41_p4 = scmp.ge.s32.totalorder %s3423_s26, 2 }
   0xe   : > { %p87_p5 = scmp.ne.s32.totalorder %s2759_s16, %s2755_s15  ;;  %p88_p6 = scmp.eq.s32.totalorder %s2362_s23, 0 }
   0xf   : > { %p162_p7 = scmp.eq.s32.totalorder %s2362_s23, 3  ;;  %s3425_s26 = smov (%p41_p4, %s3423_s26), 0 }
  0x10   : > { %3404 = sst [smem:[#allocation9_spill]] %s3425_s26  ;;  %p2885_p8 = por %p88_p6, %p87_p5 }
  0x11   : > { %p2889_p9 = por %p162_p7, %p81_p1  ;;  %s69_s6 = ssub.s32 %s2779_s21, %s3425_s26 }
  0x12   : > { %p168_p10 = scmp.eq.s32.totalorder %s2363_s24, 3  ;;  %s71_s7 = sor.u32 %s70_s28, %s69_s6 }
  0x13   : > { %s3406_s5 = scalar_select %p2889_p9, 1, 0 }
  0x14   : > { %p72_p11 = scmp.eq.s32.totalorder %s71_s7, 0  ;;  %p2895_p12 = por %p168_p10, %p87_p5 }
  0x15   : > { %p2575_p13 = scmp.lt.s32.totalorder %s2783_s22, 4  ;;  %s205_s9 = sand.u32 1, %s2763_s17  }
  0x16   : > { %s3407_s8 = scalar_select %p2895_p12, 1, 0 }
  0x17   : > { %s2902_s10 = scalar_select %p72_p11, %s2763_s17, %s74_s27  }
  0x18   : > { %s2368_s11 = sshll.u32 %s205_s9, 5  ;;  %s2369_s12 = sshll.u32 %s2779_s21, 3 }
  0x19   : > { %s214_s13 = sadd.s32 %s2775_s20, %s2369_s12  ;;  %s209_s14 = scalar_lea.vmem [#allocation2], %s2368_s11 }
  0x1a   : > { %s217_s23 = sshll.u32 %s209_s14, 4  ;;  %s2370_s25 = sshll.u32 %s214_s13, 7  ;;  %s2906_s23 = int_to_ptr.vmem [resolvable:$true] %s217_s23 }
  0x1b   : > { %s2911_s28 = scalar_lea.hbm %s3395_s1, %s2370_s25  ;;  %p2915_p0 = pnand %p2575_p13, %p2877_p3 }
  0x1c   : > { %s2919_s6 = scalar_lea.sflag [#allocation3], %s205_s9  ;;  %s2655_s7 = scalar_lea.hbm %s2911_s28, 512 }
  0x1d   : > { %p2656_p1 = scmp.ne.s32.totalorder %s2911_s28, %s2655_s7  ;;  %p2657_p2 = pneg %p2915_p0 }
  0x1e   : > { %s2660_s29 = scalar_lea.hbm %s3395_s1, 2048  ;;  %p2661_p3 = scmp.lt.u32.totalorder %s2911_s28, %s3395_s1 }
  0x1f   : > { %p2658_p4 = pnand %p2657_p2, %p2656_p1  ;;  %p2662_p6 = scmp.lt.u32.totalorder %s2660_s29, %s2655_s7 }
  0x20   : > { %p2664_p10 = scmp.lt.u32.totalorder %s2655_s7, %s2911_s28 }
  0x21   : > { %p2659_p5 = pneg %p2658_p4  ;;  %p2663_p7 = por %p2662_p6, %p2661_p3 }
  0x23   : > { %p2665_p11 = por %p2664_p10, %p2663_p7 }
  0x25   : > { %p2666_p13 = pnand %p2665_p11, %p2659_p5 }
  0x27   : > { %2669 = shalt.err (!%p2666_p13)
}
  0x28   : > { %s2670_s9 = scalar_lea.vmem %s2906_s23, 512  ;;  %s2785_s13 = smov [#allocation2]  }
  0x29   : > { %p2671_p1 = scmp.ne.s32.totalorder %s2906_s23, %s2670_s9  ;;  %s2675_s14 = sshll.u32 %s2785_s13, 4  ;;  %s2676_s14 = int_to_ptr.vmem [resolvable:$false] %s2675_s14 }
  0x2a   : > { %s2677_s24 = scalar_lea.vmem %s2676_s14, 1024  ;;  %p2678_p9 = scmp.lt.s32.totalorder %s2906_s23, %s2676_s14 }
  0x2b   : > { %p2673_p4 = pnand %p2671_p1, %p2657_p2  ;;  %p2679_p3 = scmp.lt.s32.totalorder %s2677_s24, %s2670_s9 }
  0x2d   : > { %p2674_p12 = pneg %p2673_p4  ;;  %p2680_p6 = por %p2679_p3, %p2678_p9 }
  0x2f   : > { %p2681_p7 = pnand %p2680_p6, %p2674_p12 }
  0x31   : > { %2684 = shalt.err (!%p2681_p7)
}
  0x32   : > { %s2786_s7 = smov 256   ;;  %s2787_s25 = smov 128  }
  0x33   : > { %s2788_s26 = smov 8   ;;  %p2371_p2 = scmp.ge.s32.totalorder %s2783_s22, 1 }
  0x34   : > { %2570 = dma.hbm_to_vmem [thread:$0]  (!%p2915_p0), %s2911_s28, 512, %s2906_s23, %s2919_s6, %s2786_s7, %s2787_s25, %s2788_s26  }
  0x35   : > { %p225_p5 = scmp.lt.s32.totalorder %s2783_s22, 5 }
  0x37   : > { %p226_p10 = pnand %p2371_p2, %p225_p5 }
  0x38   : > { %s2950_s29 = sand.u32 (!%p226_p10), 1, %s2759_s16  }
  0x39   : > { %229 = sbr.rel (%p226_p10) target bundleno = 672 (0x2a0), region = 36  ;;  %s2372_s11 = sshll.u32 (!%p226_p10), %s2950_s29, 5 }
  0x3a   : > { %s232_s12 = scalar_lea.sflag (!%p226_p10), [#allocation3], %s2950_s29  ;;  %s2954_s9 = scalar_lea.vmem (!%p226_p10), [#allocation2], %s2372_s11 }
  0x40   : > { %2746 = dma.done.wait (%p2885_p8), %s232_s12, 512  }
  0x41   : > { %2748 = vsyncadd (%p2885_p8), %s232_s12, 4294966784  ;;  %v2789_v0 = vmov 0.0   ;;  %vm2790_vm0 = vmmov 0   ;;  %v2791_v1 = vmov 0   ;;  %vm293_vm1 = vcmask 1041409   ;;  %v2972_v8 = vld [vmem:[%s3396_s2] sm:$0xff] }
  0x42   : > { %2443 = vmatprep.subr.mxu0 %v2789_v0  ;;  %2445 = vmatprep.mubr.msk.f32.mxu0 %vm2790_vm0, %v2789_v0  ;;  %vm296_vm2 = vcmask 1042434   ;;  %vm299_vm3 = vcmask 1043459   ;;  %v277_v2 = vld [vmem:[%s2954_s9] sm:$0x1]  ;;  %v278_v3 = vld [vmem:[%s2954_s9 + $0x8] sm:$0x1] }
  0x43   : > { %2653 = vset.pattern.permute.xlu0 %v2791_v1  ;;  %2654 = vset.pattern.permute.xlu1 %v2791_v1  ;;  %v279_v4 = vld [vmem:[%s2954_s9 + $0x10] sm:$0x1]  ;;  %v280_v5 = vld [vmem:[%s2954_s9 + $0x18] sm:$0x1]  ;;  %v292_v6 = vrot.slane %v278_v3, 7  ;;  %vm305_vm4 = vcmask 1043456  }
  0x44   : > { %2452 = vmatprep.mubr.msk.f32.mxu1 %vm2790_vm0, %v2789_v0  ;;  %v295_v7 = vrot.slane %v279_v4, 6  ;;  %v298_v9 = vrot.slane %v280_v5, 5  ;;  %vm301_vm5 = vcmask 31744   ;;  %v527_v10 = vld [vmem:[%s2954_s9 + $0x1] sm:$0x1]  ;;  %285 = vperm.xlu0 %2653, %v2972_v8   ;;  %v2982_v13 = vld [vmem:[%s3394_s0] sm:$0xff] }
  0x45   : > { %v528_v11 = vld [vmem:[%s2954_s9 + $0x9] sm:$0x1]  ;;  %777 = vperm.xlu1 %2654, %v2972_v8   ;;  %v294_v12 = vsel %vm293_vm1, %v292_v6, %v277_v2  ;;  %v529_v14 = vld [vmem:[%s2954_s9 + $0x11] sm:$0x1]  ;;  %v530_v15 = vld [vmem:[%s2954_s9 + $0x19] sm:$0x1] }
  0x46   : > { %v542_v16 = vrot.slane %v528_v11, 7  ;;  %v297_v17 = vsel %vm296_vm2, %v295_v7, %v294_v12  ;;  %v544_v18 = vrot.slane %v529_v14, 6  ;;  %v546_v19 = vrot.slane %v530_v15, 5  ;;  %v769_v20 = vld [vmem:[%s2954_s9 + $0x2] sm:$0x1]  ;;  %s2793_s7 = smov 32  }
  0x47   : > { %v770_v21 = vld [vmem:[%s2954_s9 + $0xa] sm:$0x1]  ;;  %v300_v22 = vsel %vm299_vm3, %v298_v9, %v297_v17  ;;  %v771_v24 = vld [vmem:[%s2954_s9 + $0x12] sm:$0x1]  ;;  %v772_v25 = vld [vmem:[%s2954_s9 + $0x1a] sm:$0x1] }
  0x48   : > { %v543_v23 = vsel %vm293_vm1, %v542_v16, %v527_v10  ;;  %v784_v26 = vrot.slane %v770_v21, 7  ;;  %2444 = vmatpush3.msk.msra.mxu0 %vm305_vm4, %v300_v22  ;;  %v786_v28 = vrot.slane %v771_v24, 6  ;;  %v788_v29 = vrot.slane %v772_v25, 5  ;;  %v1011_v30 = vld [vmem:[%s2954_s9 + $0x3] sm:$0x1]  ;;  %535 = vperm.xlu0 %2653, %v2972_v8   ;;  %v379_v24 = vld [vmem:[%s3397_s3 + $0x8] sm:$0xff] }
  0x49   : > { %v545_v27 = vsel %vm296_vm2, %v544_v18, %v543_v23  ;;  %v1012_v31 = vld [vmem:[%s2954_s9 + $0xb] sm:$0x1]  ;;  %2446 = vmatmul.mubr.msk.f32.vlgmr.msra.gmra.mrb[0].mxu0 %vm301_vm5, %v2982_v13  ;;  %2455 = vmatprep.subr.mxu0 %v2789_v0  ;;  %v1013_v34 = vld [vmem:[%s2954_s9 + $0x13] sm:$0x1]  ;;  %v1014_v35 = vld [vmem:[%s2954_s9 + $0x1b] sm:$0x1] }
  0x4a   : > { %v547_v32 = vsel %vm299_vm3, %v546_v19, %v545_v27  ;;  %v785_v33 = vsel %vm293_vm1, %v784_v26, %v769_v20  ;;  %v1026_v36 = vrot.slane %v1012_v31, 7  ;;  %2457 = vmatprep.mubr.msk.f32.mxu0 %vm2790_vm0, %v2789_v0  ;;  %v1028_v38 = vrot.slane %v1013_v34, 6  ;;  %v1253_v40 = vld [vmem:[%s2954_s9 + $0x4] sm:$0x1]  ;;  %v1254_v41 = vld [vmem:[%s2954_s9 + $0xc] sm:$0x1]  ;;  %1019 = vperm.xlu1 %2654, %v2972_v8  }
  0x4b   : > { %2456 = vmatpush3.msk.msra.mxu0 %vm305_vm4, %v547_v32  ;;  %v787_v37 = vsel %vm296_vm2, %v786_v28, %v785_v33  ;;  %v1030_v39 = vrot.slane %v1014_v35, 5  ;;  %v1255_v44 = vld [vmem:[%s2954_s9 + $0x14] sm:$0x1]  ;;  %v1268_v45 = vrot.slane %v1254_v41, 7  ;;  %v1256_v47 = vld [vmem:[%s2954_s9 + $0x1c] sm:$0x1] }
  0x4c   : > { %2467 = vmatprep.subr.mxu0 %v2789_v0  ;;  %v789_v42 = vsel %vm299_vm3, %v788_v29, %v787_v37  ;;  %v1027_v43 = vsel %vm293_vm1, %v1026_v36, %v1011_v30  ;;  %v1270_v48 = vrot.slane %v1255_v44, 6  ;;  %v1496_v49 = vld [vmem:[%s2954_s9 + $0xd] sm:$0x1]  ;;  %1261 = vperm.xlu0 %2653, %v2972_v8   ;;  %v2792_v50 = vmov 0.0|0.0   ;;  %v1497_v52 = vld [vmem:[%s2954_s9 + $0x15] sm:$0x1] }
  0x4d   : > { %v1029_v46 = vsel %vm296_vm2, %v1028_v38, %v1027_v43  ;;  %2539 = vmatprep.subr.bf16.mxu1 %v2792_v50  ;;  %2458 = vmatmul.mubr.msk.f32.vlgmr.msra.gmra.mrb[2].mxu0 %vm301_vm5, %v2982_v13  ;;  %v1269_v51 = vsel %vm293_vm1, %v1268_v45, %v1253_v40  ;;  %v1510_v53 = vrot.slane %v1496_v49, 7  ;;  %v1495_v54 = vld [vmem:[%s2954_s9 + $0x5] sm:$0x1]  ;;  %v1738_v55 = vld [vmem:[%s2954_s9 + $0xe] sm:$0x1]  ;;  %v1272_v57 = vrot.slane %v1256_v47, 5 }
  0x4e   : > { %2468 = vmatpush3.msk.msra.mxu0 %vm305_vm4, %v789_v42  ;;  %2469 = vmatprep.mubr.msk.f32.mxu0 %vm2790_vm0, %v2789_v0  ;;  %v1031_v56 = vsel %vm299_vm3, %v1030_v39, %v1029_v46  ;;  %v1271_v58 = vsel %vm296_vm2, %v1270_v48, %v1269_v51  ;;  %v1498_v59 = vld [vmem:[%s2954_s9 + $0x1d] sm:$0x1]  ;;  %v1512_v60 = vrot.slane %v1497_v52, 6  ;;  %v1739_v62 = vld [vmem:[%s2954_s9 + $0x16] sm:$0x1]  ;;  %v1752_v63 = vrot.slane %v1738_v55, 7 }
  0x4f   : > { %2479 = vmatprep.subr.mxu0 %v2789_v0  ;;  %1503 = vperm.xlu1 %2654, %v2972_v8   ;;  %v1511_v61 = vsel %vm293_vm1, %v1510_v53, %v1495_v54  ;;  %v1737_v1 = vld [vmem:[%s2954_s9 + $0x6] sm:$0x1]  ;;  %v1980_v2 = vld [vmem:[%s2954_s9 + $0xf] sm:$0x1]  ;;  %v1273_v3 = vsel %vm299_vm3, %v1272_v57, %v1271_v58  ;;  %v1514_v4 = vrot.slane %v1498_v59, 5  ;;  %v1754_v7 = vrot.slane %v1739_v62, 6 }
  0x50   : > { %1745 = vperm.xlu0 %2653, %v2972_v8   ;;  %v1513_v5 = vsel %vm296_vm2, %v1512_v60, %v1511_v61  ;;  %v1740_v6 = vld [vmem:[%s2954_s9 + $0x1e] sm:$0x1]  ;;  %v1753_v9 = vsel %vm293_vm1, %v1752_v63, %v1737_v1  ;;  %v1981_v10 = vld [vmem:[%s2954_s9 + $0x17] sm:$0x1]  ;;  %v1994_v11 = vrot.slane %v1980_v2, 7  ;;  %v378_v23 = vld [vmem:[%s3397_s3] sm:$0xff] }
  0x51   : > { %2470 = vmatmul.mubr.msk.f32.vlgmr.msra.gmra.mrb[4].mxu0 %vm301_vm5, %v2982_v13  ;;  %v1979_v12 = vld [vmem:[%s2954_s9 + $0x7] sm:$0x1]  ;;  %v1756_v14 = vrot.slane %v1740_v6, 5  ;;  %v1755_v15 = vsel %vm296_vm2, %v1754_v7, %v1753_v9  ;;  %v1982_v16 = vld [vmem:[%s2954_s9 + $0x1f] sm:$0x1]  ;;  %v1996_v17 = vrot.slane %v1981_v10, 6  ;;  %v2540_v25 = vpack.c.bf16 %v379_v24, %v378_v23 }
  0x52   : > { %2480 = vmatpush3.msk.msra.mxu0 %vm305_vm4, %v1031_v56  ;;  %2481 = vmatprep.mubr.msk.f32.mxu0 %vm2790_vm0, %v2789_v0  ;;  %v1995_v18 = vsel %vm293_vm1, %v1994_v11, %v1979_v12  ;;  %v1998_v20 = vrot.slane %v1982_v16, 5  ;;  %vm380_vm6 = vcmask 130048   ;;  %v2794_v10 = vmov 1966171168   ;;  %s2373_s25 = sshll.u32 %s2950_s29, 6  ;;  %s2399_s11 = sshll.u32 %s2771_s19, 4 }
  0x53   : > { %2491 = vmatprep.subr.mxu0 %v2789_v0  ;;  %1987 = vperm.xlu1 %2654, %v2972_v8   ;;  %v1515_v8 = vsel %vm299_vm3, %v1514_v4, %v1513_v5  ;;  %v1757_v19 = vsel %vm299_vm3, %v1756_v14, %v1755_v15  ;;  %v1997_v21 = vsel %vm296_vm2, %v1996_v17, %v1995_v18  ;;  %v463_v11 = vunpack.c.l.s4 %v2794_v10  ;;  %s3145_s26 = scalar_lea.vmem [#allocation5], %s2373_s25  ;;  %s3293_s19 = sadd.s32 %s2767_s18, %s2399_s11 }
  0x54   : > { %v1999_v22 = vsel %vm299_vm3, %v1998_v20, %v1997_v21  ;;  %2541 = vmatpush3.bf16.msra.mxu1 %v2540_v25  ;;  %v465_v12 = vlaneseq  ;;  %vm458_vm7 = vcmask 261120   ;;  %vm518_vm8 = vcmask 516096   ;;  %s2400_s18 = sshll.u32 %s3293_s19, 7  ;;  %s2239_s12 = sshll.u32 %s3145_s26, 4  ;;  %s3332_s12 = int_to_ptr.vmem [resolvable:$true] %s2239_s12 }
  0x55   : > { %2482 = vmatmul.mubr.msk.f32.vlgmr.msra.gmra.mrb[6].mxu0 %vm301_vm5, %v2982_v13  ;;  %2542 = vmatprep.subr.bf16.mxu1 %v2792_v50  ;;  %s3330_s23 = scalar_lea.hbm %s3398_s4, %s2400_s18  ;;  %s2222_s28 = scalar_lea.sflag [#allocation4], %s2950_s29 }
  0x56   : > { %2492 = vmatpush3.msk.msra.mxu0 %vm305_vm4, %v1273_v3  ;;  %2493 = vmatprep.mubr.msk.f32.mxu0 %vm2790_vm0, %v2789_v0  ;;  %v466_v14 = vshrl.u32 %v465_v12, 7  ;;  %s2685_s27 = scalar_lea.vmem %s3332_s12, 1024  ;;  %p3409_p9 = scmp.ne.s32.totalorder %s3406_s5, 0 }
  0x57   : > { %2503 = vmatprep.subr.mxu0 %v2789_v0  ;;  %p2686_p8 = scmp.ne.s32.totalorder %s3332_s12, %s2685_s27  ;;  %s2795_s6 = smov [#allocation5]  }
  0x58   : > { %s2689_s13 = sshll.u32 %s2795_s6, 4  ;;  %s2690_s13 = int_to_ptr.vmem [resolvable:$false] %s2689_s13 }
  0x59   : > { %2494 = vmatmul.mubr.msk.f32.vlgmr.msra.gmra.mrb[8].mxu0 %vm301_vm5, %v2982_v13  ;;  %p2687_p12 = pnand %p2686_p8, %p3409_p9  ;;  %s2691_s14 = scalar_lea.vmem %s2690_s13, 2048 }
  0x5a   : > { %2504 = vmatpush3.msk.msra.mxu0 %vm305_vm4, %v1515_v8  ;;  %2505 = vmatprep.mubr.msk.f32.mxu0 %vm2790_vm0, %v2789_v0  ;;  %v464_v8 = vunpack.c.0.s8 %v463_v11  ;;  %p2692_p11 = scmp.lt.s32.totalorder %s3332_s12, %s2690_s13  ;;  %p2693_p13 = scmp.lt.s32.totalorder %s2691_s14, %s2685_s27 }
  0x5b   : > { %2515 = vmatprep.subr.mxu0 %v2789_v0  ;;  %p2688_p0 = pneg %p2687_p12 }
  0x5c   : > { %v3135_v15 = vsub.s32 %v464_v8, %v466_v14  ;;  %p2694_p1 = por %p2693_p13, %p2692_p11 }
  0x5d   : > { %2506 = vmatmul.mubr.msk.f32.vlgmr.msra.gmra.mrb[10].mxu0 %vm301_vm5, %v2982_v13 }
  0x5e   : > { %2516 = vmatpush3.msk.msra.mxu0 %vm305_vm4, %v1757_v19  ;;  %2517 = vmatprep.mubr.msk.f32.mxu0 %vm2790_vm0, %v2789_v0  ;;  %p2695_p4 = pnand %p2694_p1, %p2688_p0 }
  0x5f   : > { %2527 = vmatprep.subr.mxu0 %v2789_v0 }
  0x61   : > { %2518 = vmatmul.mubr.msk.f32.vlgmr.msra.gmra.mrb[12].mxu0 %vm301_vm5, %v2982_v13 }
  0x62   : > { %2528 = vmatpush3.msk.msra.mxu0 %vm305_vm4, %v1999_v22  ;;  %2529 = vmatprep.mubr.msk.f32.mxu0 %vm2790_vm0, %v2789_v0 }
  0x65   : > { %2530 = vmatmul.mubr.msk.f32.vlgmr.msra.gmra.mrb[14].mxu0 %vm301_vm5, %v2982_v13 }
  0xc3   : > { %v286_v26 = vpop.permute.xlu0 %285 }
  0xc4   : > { %v778_v33 = vpop.permute.xlu1 %777 }
  0xc7   : > { %v536_v13 = vpop.permute.xlu0 %535 }
  0xc9   : > { %v1020_v37 = vpop.permute.xlu1 %1019 }
  0xcb   : > { %v1262_v41 = vpop.permute.xlu0 %1261 }
  0xce   : > { %v1504_v45 = vpop.permute.xlu1 %1503 }
  0xcf   : > { %v1746_v49 = vpop.permute.xlu0 %1745 }
  0xd2   : > { %v1988_v54 = vpop.permute.xlu1 %1987 }
 0x11c   : > { %v374_v27 = vpop.f32.mrb[0].mxu0 }
 0x11d   : > { %v375_v28 = vadd.f32 %v374_v27, %v286_v26  ;;  %v2447_v29 = vpop.f32.mrb[1].mxu0 }
 0x11f   : > { %2453 = vmatmul.mubr.msk.f32.vlgmr.msra.gmra.mrb[0].mxu1 %vm380_vm6, %v375_v28 }
 0x120   : > { %v619_v30 = vpop.f32.mrb[2].mxu0  ;;  %2544 = vmatpush3.bf16.msra.mxu1 %v2540_v25  ;;  %2464 = vmatprep.mubr.msk.f32.mxu1 %vm2790_vm0, %v2789_v0 }
 0x121   : > { %v620_v31 = vadd.f32 %v619_v30, %v536_v13  ;;  %v2459_v32 = vpop.f32.mrb[3].mxu0  ;;  %2545 = vmatprep.subr.bf16.mxu1 %v2792_v50 }
 0x123   : > { %2465 = vmatmul.mubr.msk.f32.vlgmr.msra.gmra.mrb[2].mxu1 %vm380_vm6, %v620_v31 }
 0x124   : > { %v861_v34 = vpop.f32.mrb[4].mxu0  ;;  %2547 = vmatpush3.bf16.msra.mxu1 %v2540_v25  ;;  %2476 = vmatprep.mubr.msk.f32.mxu1 %vm2790_vm0, %v2789_v0 }
 0x125   : > { %v862_v35 = vadd.f32 %v861_v34, %v778_v33  ;;  %v2471_v36 = vpop.f32.mrb[5].mxu0  ;;  %2548 = vmatprep.subr.bf16.mxu1 %v2792_v50 }
 0x127   : > { %2477 = vmatmul.mubr.msk.f32.vlgmr.msra.gmra.mrb[4].mxu1 %vm380_vm6, %v862_v35 }
 0x128   : > { %v1103_v38 = vpop.f32.mrb[6].mxu0  ;;  %2550 = vmatpush3.bf16.msra.mxu1 %v2540_v25  ;;  %2488 = vmatprep.mubr.msk.f32.mxu1 %vm2790_vm0, %v2789_v0 }
 0x129   : > { %v1104_v39 = vadd.f32 %v1103_v38, %v1020_v37  ;;  %v2483_v40 = vpop.f32.mrb[7].mxu0  ;;  %2551 = vmatprep.subr.bf16.mxu1 %v2792_v50 }
 0x12b   : > { %2489 = vmatmul.mubr.msk.f32.vlgmr.msra.gmra.mrb[6].mxu1 %vm380_vm6, %v1104_v39 }
 0x12c   : > { %v1345_v42 = vpop.f32.mrb[8].mxu0  ;;  %2553 = vmatpush3.bf16.msra.mxu1 %v2540_v25  ;;  %2500 = vmatprep.mubr.msk.f32.mxu1 %vm2790_vm0, %v2789_v0 }
 0x12d   : > { %v1346_v43 = vadd.f32 %v1345_v42, %v1262_v41  ;;  %v2495_v44 = vpop.f32.mrb[9].mxu0  ;;  %2554 = vmatprep.subr.bf16.mxu1 %v2792_v50 }
 0x12f   : > { %2501 = vmatmul.mubr.msk.f32.vlgmr.msra.gmra.mrb[8].mxu1 %vm380_vm6, %v1346_v43 }
 0x130   : > { %v1587_v46 = vpop.f32.mrb[10].mxu0  ;;  %2556 = vmatpush3.bf16.msra.mxu1 %v2540_v25  ;;  %2512 = vmatprep.mubr.msk.f32.mxu1 %vm2790_vm0, %v2789_v0 }
 0x131   : > { %v1588_v47 = vadd.f32 %v1587_v46, %v1504_v45  ;;  %v2507_v48 = vpop.f32.mrb[11].mxu0  ;;  %2557 = vmatprep.subr.bf16.mxu1 %v2792_v50 }
 0x133   : > { %2513 = vmatmul.mubr.msk.f32.vlgmr.msra.gmra.mrb[10].mxu1 %vm380_vm6, %v1588_v47 }
 0x134   : > { %v1829_v51 = vpop.f32.mrb[12].mxu0  ;;  %2559 = vmatpush3.bf16.msra.mxu1 %v2540_v25  ;;  %2524 = vmatprep.mubr.msk.f32.mxu1 %vm2790_vm0, %v2789_v0 }
 0x135   : > { %v1830_v52 = vadd.f32 %v1829_v51, %v1746_v49  ;;  %v2519_v53 = vpop.f32.mrb[13].mxu0  ;;  %2560 = vmatprep.subr.bf16.mxu1 %v2792_v50 }
 0x137   : > { %2525 = vmatmul.mubr.msk.f32.vlgmr.msra.gmra.mrb[12].mxu1 %vm380_vm6, %v1830_v52 }
 0x138   : > { %v2071_v55 = vpop.f32.mrb[14].mxu0  ;;  %2562 = vmatpush3.bf16.msra.mxu1 %v2540_v25  ;;  %2536 = vmatprep.mubr.msk.f32.mxu1 %vm2790_vm0, %v2789_v0 }
 0x139   : > { %v2072_v56 = vadd.f32 %v2071_v55, %v1988_v54  ;;  %v2531_v57 = vpop.f32.mrb[15].mxu0 }
 0x13b   : > { %2537 = vmatmul.mubr.msk.f32.vlgmr.msra.gmra.mrb[14].mxu1 %vm380_vm6, %v2072_v56 }
 0x1f2   : > { %v450_v58 = vpop.f32.mrb[0].mxu1 }
 0x1f3   : > { %455 = vrot.lane.b32.xlu0 %v450_v58, %s2793_s7  ;;  %v2454_v59 = vpop.f32.mrb[1].mxu1 }
 0x1f6   : > { %v694_v60 = vpop.f32.mrb[2].mxu1 }
 0x1f7   : > { %699 = vrot.lane.b32.xlu1 %v694_v60, %s2793_s7  ;;  %v2466_v61 = vpop.f32.mrb[3].mxu1 }
 0x1fa   : > { %v936_v50 = vpop.f32.mrb[4].mxu1 }
 0x1fb   : > { %941 = vrot.lane.b32.xlu0 %v936_v50, %s2793_s7  ;;  %v2478_v62 = vpop.f32.mrb[5].mxu1 }
 0x1fe   : > { %v3120_v63 = vpop.f32.mrb[6].mxu1 }
 0x1ff   : > { %1183 = vrot.lane.b32.xlu1 %v3120_v63, %s2793_s7  ;;  %v2490_v1 = vpop.f32.mrb[7].mxu1 }
 0x202   : > { %v3123_v0 = vpop.f32.mrb[8].mxu1 }
 0x203   : > { %1425 = vrot.lane.b32.xlu0 %v3123_v0, %s2793_s7  ;;  %v2502_v2 = vpop.f32.mrb[9].mxu1 }
 0x206   : > { %v3126_v3 = vpop.f32.mrb[10].mxu1 }
 0x207   : > { %1667 = vrot.lane.b32.xlu1 %v3126_v3, %s2793_s7  ;;  %v2514_v4 = vpop.f32.mrb[11].mxu1 }
 0x20a   : > { %v3129_v5 = vpop.f32.mrb[12].mxu1 }
 0x20b   : > { %1909 = vrot.lane.b32.xlu0 %v3129_v5, %s2793_s7  ;;  %v2526_v6 = vpop.f32.mrb[13].mxu1 }
 0x20e   : > { %v3132_v7 = vpop.f32.mrb[14].mxu1 }
 0x20f   : > { %2151 = vrot.lane.b32.xlu1 %v3132_v7, %s2793_s7  ;;  %v2538_v9 = vpop.f32.mrb[15].mxu1 }
 0x265   : > { %v456_v16 = vpop.permute.xlu0 %455 }
 0x266   : > { %v459_v17 = vsel %vm458_vm7, %v450_v58, %v456_v16 }
 0x267   : > { %v461_v18 = vcombine.high %v459_v17, %v459_v17  ;;  %v468_v19 = vrot.slane %v459_v17, %v3135_v15 }
 0x269   : > { %v475_v20 = vrot.slane %v461_v18, %v3135_v15  ;;  %v476_v21 = vcombine.high %v468_v19, %v468_v19  ;;  %v484_v22 = vrot.slane %v468_v19, %v3135_v15  ;;  %v700_v23 = vpop.permute.xlu1 %699 }
 0x26a   : > { %v702_v24 = vsel %vm458_vm7, %v694_v60, %v700_v23 }
 0x26b   : > { %v477_v25 = vcombine.high %v475_v20, %v475_v20  ;;  %v491_v26 = vrot.slane %v475_v20, %v3135_v15  ;;  %v498_v27 = vrot.slane %v476_v21, %v3135_v15  ;;  %v506_v28 = vcombine.high %v484_v22, %v484_v22  ;;  %519 = vst.msk [vmem:[%s3145_s26] sm:$0x1] %vm518_vm8, %v484_v22 }
 0x26c   : > { %v704_v29 = vcombine.high %v702_v24, %v702_v24  ;;  %v711_v13 = vrot.slane %v702_v24, %v3135_v15 }
 0x26d   : > { %v505_v30 = vrot.slane %v477_v25, %v3135_v15  ;;  %v507_v31 = vcombine.high %v491_v26, %v491_v26  ;;  %v508_v32 = vcombine.high %v498_v27, %v498_v27  ;;  %520 = vst.msk [vmem:[%s3145_s26 + $0x8] sm:$0x1] %vm518_vm8, %v498_v27  ;;  %521 = vst.msk [vmem:[%s3145_s26 + $0x10] sm:$0x1] %vm518_vm8, %v506_v28  ;;  %v942_v33 = vpop.permute.xlu0 %941 }
 0x26e   : > { %523 = vst.msk [vmem:[%s3145_s26 + $0x20] sm:$0x1] %vm518_vm8, %v491_v26  ;;  %v718_v34 = vrot.slane %v704_v29, %v3135_v15  ;;  %v719_v35 = vcombine.high %v711_v13, %v711_v13  ;;  %v727_v36 = vrot.slane %v711_v13, %v3135_v15  ;;  %v944_v37 = vsel %vm458_vm7, %v936_v50, %v942_v33 }
 0x26f   : > { %v509_v38 = vcombine.high %v505_v30, %v505_v30  ;;  %522 = vst.msk [vmem:[%s3145_s26 + $0x18] sm:$0x1] %vm518_vm8, %v508_v32  ;;  %524 = vst.msk [vmem:[%s3145_s26 + $0x28] sm:$0x1] %vm518_vm8, %v505_v30  ;;  %v946_v39 = vcombine.high %v944_v37, %v944_v37  ;;  %v953_v40 = vrot.slane %v944_v37, %v3135_v15 }
 0x270   : > { %525 = vst.msk [vmem:[%s3145_s26 + $0x30] sm:$0x1] %vm518_vm8, %v507_v31  ;;  %v720_v41 = vcombine.high %v718_v34, %v718_v34  ;;  %v734_v42 = vrot.slane %v718_v34, %v3135_v15  ;;  %v741_v43 = vrot.slane %v719_v35, %v3135_v15  ;;  %v749_v44 = vcombine.high %v727_v36, %v727_v36 }
 0x271   : > { %761 = vst.msk [vmem:[%s3145_s26 + $0x1] sm:$0x1] %vm518_vm8, %v727_v36  ;;  %526 = vst.msk [vmem:[%s3145_s26 + $0x38] sm:$0x1] %vm518_vm8, %v509_v38  ;;  %v960_v45 = vrot.slane %v946_v39, %v3135_v15  ;;  %v961_v46 = vcombine.high %v953_v40, %v953_v40  ;;  %v969_v47 = vrot.slane %v953_v40, %v3135_v15  ;;  %v1184_v48 = vpop.permute.xlu1 %1183 }
 0x272   : > { %v748_v49 = vrot.slane %v720_v41, %v3135_v15  ;;  %v750_v51 = vcombine.high %v734_v42, %v734_v42  ;;  %v751_v52 = vcombine.high %v741_v43, %v741_v43  ;;  %762 = vst.msk [vmem:[%s3145_s26 + $0x9] sm:$0x1] %vm518_vm8, %v741_v43  ;;  %763 = vst.msk [vmem:[%s3145_s26 + $0x11] sm:$0x1] %vm518_vm8, %v749_v44 }
 0x273   : > { %765 = vst.msk [vmem:[%s3145_s26 + $0x21] sm:$0x1] %vm518_vm8, %v734_v42  ;;  %v1186_v53 = vsel %vm458_vm7, %v3120_v63, %v1184_v48  ;;  %v962_v54 = vcombine.high %v960_v45, %v960_v45  ;;  %v976_v55 = vrot.slane %v960_v45, %v3135_v15  ;;  %v983_v56 = vrot.slane %v961_v46, %v3135_v15 }
 0x274   : > { %v991_v57 = vcombine.high %v969_v47, %v969_v47  ;;  %1003 = vst.msk [vmem:[%s3145_s26 + $0x2] sm:$0x1] %vm518_vm8, %v969_v47  ;;  %v752_v58 = vcombine.high %v748_v49, %v748_v49  ;;  %764 = vst.msk [vmem:[%s3145_s26 + $0x19] sm:$0x1] %vm518_vm8, %v751_v52  ;;  %v1188_v59 = vcombine.high %v1186_v53, %v1186_v53 }
 0x275   : > { %766 = vst.msk [vmem:[%s3145_s26 + $0x29] sm:$0x1] %vm518_vm8, %v748_v49  ;;  %767 = vst.msk [vmem:[%s3145_s26 + $0x31] sm:$0x1] %vm518_vm8, %v750_v51  ;;  %v1195_v60 = vrot.slane %v1186_v53, %v3135_v15  ;;  %v990_v61 = vrot.slane %v962_v54, %v3135_v15  ;;  %v992_v50 = vcombine.high %v976_v55, %v976_v55  ;;  %v1426_v63 = vpop.permute.xlu0 %1425 }
 0x276   : > { %v993_v62 = vcombine.high %v983_v56, %v983_v56  ;;  %1004 = vst.msk [vmem:[%s3145_s26 + $0xa] sm:$0x1] %vm518_vm8, %v983_v56  ;;  %1005 = vst.msk [vmem:[%s3145_s26 + $0x12] sm:$0x1] %vm518_vm8, %v991_v57  ;;  %v1202_v1 = vrot.slane %v1188_v59, %v3135_v15  ;;  %v1428_v6 = vsel %vm458_vm7, %v3123_v0, %v1426_v63 }
 0x277   : > { %1007 = vst.msk [vmem:[%s3145_s26 + $0x22] sm:$0x1] %vm518_vm8, %v976_v55  ;;  %768 = vst.msk [vmem:[%s3145_s26 + $0x39] sm:$0x1] %vm518_vm8, %v752_v58  ;;  %v1203_v2 = vcombine.high %v1195_v60, %v1195_v60  ;;  %v1211_v4 = vrot.slane %v1195_v60, %v3135_v15  ;;  %v994_v9 = vcombine.high %v990_v61, %v990_v61 }
 0x278   : > { %1006 = vst.msk [vmem:[%s3145_s26 + $0x1a] sm:$0x1] %vm518_vm8, %v993_v62  ;;  %1008 = vst.msk [vmem:[%s3145_s26 + $0x2a] sm:$0x1] %vm518_vm8, %v990_v61  ;;  %v1430_v10 = vcombine.high %v1428_v6, %v1428_v6  ;;  %v1437_v11 = vrot.slane %v1428_v6, %v3135_v15  ;;  %v1204_v12 = vcombine.high %v1202_v1, %v1202_v1 }
 0x279   : > { %1009 = vst.msk [vmem:[%s3145_s26 + $0x32] sm:$0x1] %vm518_vm8, %v992_v50  ;;  %v1218_v8 = vrot.slane %v1202_v1, %v3135_v15  ;;  %v1225_v14 = vrot.slane %v1203_v2, %v3135_v15  ;;  %v1233_v16 = vcombine.high %v1211_v4, %v1211_v4  ;;  %1245 = vst.msk [vmem:[%s3145_s26 + $0x3] sm:$0x1] %vm518_vm8, %v1211_v4  ;;  %v1668_v19 = vpop.permute.xlu1 %1667 }
 0x27a   : > { %1010 = vst.msk [vmem:[%s3145_s26 + $0x3a] sm:$0x1] %vm518_vm8, %v994_v9  ;;  %v1444_v0 = vrot.slane %v1430_v10, %v3135_v15  ;;  %v1445_v17 = vcombine.high %v1437_v11, %v1437_v11  ;;  %v1453_v18 = vrot.slane %v1437_v11, %v3135_v15  ;;  %v1232_v20 = vrot.slane %v1204_v12, %v3135_v15 }
 0x27b   : > { %v1234_v21 = vcombine.high %v1218_v8, %v1218_v8  ;;  %v1235_v22 = vcombine.high %v1225_v14, %v1225_v14  ;;  %1246 = vst.msk [vmem:[%s3145_s26 + $0xb] sm:$0x1] %vm518_vm8, %v1225_v14  ;;  %1247 = vst.msk [vmem:[%s3145_s26 + $0x13] sm:$0x1] %vm518_vm8, %v1233_v16  ;;  %v1670_v23 = vsel %vm458_vm7, %v3126_v3, %v1668_v19 }
 0x27c   : > { %1249 = vst.msk [vmem:[%s3145_s26 + $0x23] sm:$0x1] %vm518_vm8, %v1218_v8  ;;  %v1446_v24 = vcombine.high %v1444_v0, %v1444_v0  ;;  %v1460_v25 = vrot.slane %v1444_v0, %v3135_v15  ;;  %v1467_v26 = vrot.slane %v1445_v17, %v3135_v15  ;;  %v1475_v27 = vcombine.high %v1453_v18, %v1453_v18 }
 0x27d   : > { %1487 = vst.msk [vmem:[%s3145_s26 + $0x4] sm:$0x1] %vm518_vm8, %v1453_v18  ;;  %v1236_v28 = vcombine.high %v1232_v20, %v1232_v20  ;;  %1248 = vst.msk [vmem:[%s3145_s26 + $0x1b] sm:$0x1] %vm518_vm8, %v1235_v22  ;;  %v1672_v3 = vcombine.high %v1670_v23, %v1670_v23  ;;  %v1679_v29 = vrot.slane %v1670_v23, %v3135_v15  ;;  %v1910_v32 = vpop.permute.xlu0 %1909 }
 0x27e   : > { %1250 = vst.msk [vmem:[%s3145_s26 + $0x2b] sm:$0x1] %vm518_vm8, %v1232_v20  ;;  %1251 = vst.msk [vmem:[%s3145_s26 + $0x33] sm:$0x1] %vm518_vm8, %v1234_v21  ;;  %v1474_v13 = vrot.slane %v1446_v24, %v3135_v15  ;;  %v1476_v30 = vcombine.high %v1460_v25, %v1460_v25  ;;  %v1477_v31 = vcombine.high %v1467_v26, %v1467_v26 }
 0x27f   : > { %1488 = vst.msk [vmem:[%s3145_s26 + $0xc] sm:$0x1] %vm518_vm8, %v1467_v26  ;;  %1489 = vst.msk [vmem:[%s3145_s26 + $0x14] sm:$0x1] %vm518_vm8, %v1475_v27  ;;  %v1686_v33 = vrot.slane %v1672_v3, %v3135_v15  ;;  %v1687_v34 = vcombine.high %v1679_v29, %v1679_v29  ;;  %v1695_v35 = vrot.slane %v1679_v29, %v3135_v15 }
 0x280   : > { %1491 = vst.msk [vmem:[%s3145_s26 + $0x24] sm:$0x1] %vm518_vm8, %v1460_v25  ;;  %1252 = vst.msk [vmem:[%s3145_s26 + $0x3b] sm:$0x1] %vm518_vm8, %v1236_v28  ;;  %v1912_v36 = vsel %vm458_vm7, %v3129_v5, %v1910_v32  ;;  %v1478_v37 = vcombine.high %v1474_v13, %v1474_v13 }
 0x281   : > { %1490 = vst.msk [vmem:[%s3145_s26 + $0x1c] sm:$0x1] %vm518_vm8, %v1477_v31  ;;  %1492 = vst.msk [vmem:[%s3145_s26 + $0x2c] sm:$0x1] %vm518_vm8, %v1474_v13  ;;  %v1914_v38 = vcombine.high %v1912_v36, %v1912_v36  ;;  %v1921_v39 = vrot.slane %v1912_v36, %v3135_v15  ;;  %v1688_v40 = vcombine.high %v1686_v33, %v1686_v33  ;;  %v2152_v46 = vpop.permute.xlu1 %2151 }
 0x282   : > { %1493 = vst.msk [vmem:[%s3145_s26 + $0x34] sm:$0x1] %vm518_vm8, %v1476_v30  ;;  %v1702_v41 = vrot.slane %v1686_v33, %v3135_v15  ;;  %v1709_v42 = vrot.slane %v1687_v34, %v3135_v15  ;;  %v1717_v5 = vcombine.high %v1695_v35, %v1695_v35  ;;  %1729 = vst.msk [vmem:[%s3145_s26 + $0x5] sm:$0x1] %vm518_vm8, %v1695_v35 }
 0x283   : > { %1494 = vst.msk [vmem:[%s3145_s26 + $0x3c] sm:$0x1] %vm518_vm8, %v1478_v37  ;;  %v1928_v43 = vrot.slane %v1914_v38, %v3135_v15  ;;  %v1929_v44 = vcombine.high %v1921_v39, %v1921_v39  ;;  %v1937_v45 = vrot.slane %v1921_v39, %v3135_v15  ;;  %v1716_v47 = vrot.slane %v1688_v40, %v3135_v15 }
 0x284   : > { %v1718_v48 = vcombine.high %v1702_v41, %v1702_v41  ;;  %v1719_v49 = vcombine.high %v1709_v42, %v1709_v42  ;;  %1730 = vst.msk [vmem:[%s3145_s26 + $0xd] sm:$0x1] %vm518_vm8, %v1709_v42  ;;  %1731 = vst.msk [vmem:[%s3145_s26 + $0x15] sm:$0x1] %vm518_vm8, %v1717_v5  ;;  %v2154_v51 = vsel %vm458_vm7, %v3132_v7, %v2152_v46 }
 0x285   : > { %1733 = vst.msk [vmem:[%s3145_s26 + $0x25] sm:$0x1] %vm518_vm8, %v1702_v41  ;;  %v1930_v52 = vcombine.high %v1928_v43, %v1928_v43  ;;  %v1944_v53 = vrot.slane %v1928_v43, %v3135_v15  ;;  %v1951_v54 = vrot.slane %v1929_v44, %v3135_v15  ;;  %v1959_v55 = vcombine.high %v1937_v45, %v1937_v45 }
 0x286   : > { %1971 = vst.msk [vmem:[%s3145_s26 + $0x6] sm:$0x1] %vm518_vm8, %v1937_v45  ;;  %v1720_v56 = vcombine.high %v1716_v47, %v1716_v47  ;;  %1732 = vst.msk [vmem:[%s3145_s26 + $0x1d] sm:$0x1] %vm518_vm8, %v1719_v49  ;;  %v2156_v7 = vcombine.high %v2154_v51, %v2154_v51  ;;  %v2163_v57 = vrot.slane %v2154_v51, %v3135_v15 }
 0x287   : > { %1734 = vst.msk [vmem:[%s3145_s26 + $0x2d] sm:$0x1] %vm518_vm8, %v1716_v47  ;;  %1735 = vst.msk [vmem:[%s3145_s26 + $0x35] sm:$0x1] %vm518_vm8, %v1718_v48  ;;  %v1958_v58 = vrot.slane %v1930_v52, %v3135_v15  ;;  %v1960_v59 = vcombine.high %v1944_v53, %v1944_v53  ;;  %v1961_v60 = vcombine.high %v1951_v54, %v1951_v54 }
 0x288   : > { %1972 = vst.msk [vmem:[%s3145_s26 + $0xe] sm:$0x1] %vm518_vm8, %v1951_v54  ;;  %1973 = vst.msk [vmem:[%s3145_s26 + $0x16] sm:$0x1] %vm518_vm8, %v1959_v55  ;;  %v2170_v61 = vrot.slane %v2156_v7, %v3135_v15  ;;  %v2171_v50 = vcombine.high %v2163_v57, %v2163_v57  ;;  %v2179_v62 = vrot.slane %v2163_v57, %v3135_v15 }
 0x289   : > { %1975 = vst.msk [vmem:[%s3145_s26 + $0x26] sm:$0x1] %vm518_vm8, %v1944_v53  ;;  %1736 = vst.msk [vmem:[%s3145_s26 + $0x3d] sm:$0x1] %vm518_vm8, %v1720_v56  ;;  %v1962_v63 = vcombine.high %v1958_v58, %v1958_v58 }
 0x28a   : > { %1974 = vst.msk [vmem:[%s3145_s26 + $0x1e] sm:$0x1] %vm518_vm8, %v1961_v60  ;;  %1976 = vst.msk [vmem:[%s3145_s26 + $0x2e] sm:$0x1] %vm518_vm8, %v1958_v58  ;;  %v2172_v1 = vcombine.high %v2170_v61, %v2170_v61  ;;  %v2186_v2 = vrot.slane %v2170_v61, %v3135_v15  ;;  %v2193_v4 = vrot.slane %v2171_v50, %v3135_v15 }
 0x28b   : > { %1977 = vst.msk [vmem:[%s3145_s26 + $0x36] sm:$0x1] %vm518_vm8, %v1960_v59  ;;  %v2201_v6 = vcombine.high %v2179_v62, %v2179_v62  ;;  %2213 = vst.msk [vmem:[%s3145_s26 + $0x7] sm:$0x1] %vm518_vm8, %v2179_v62 }
 0x28c   : > { %1978 = vst.msk [vmem:[%s3145_s26 + $0x3e] sm:$0x1] %vm518_vm8, %v1962_v63  ;;  %v2200_v9 = vrot.slane %v2172_v1, %v3135_v15  ;;  %v2202_v10 = vcombine.high %v2186_v2, %v2186_v2  ;;  %v2203_v11 = vcombine.high %v2193_v4, %v2193_v4  ;;  %2214 = vst.msk [vmem:[%s3145_s26 + $0xf] sm:$0x1] %vm518_vm8, %v2193_v4 }
 0x28d   : > { %2215 = vst.msk [vmem:[%s3145_s26 + $0x17] sm:$0x1] %vm518_vm8, %v2201_v6  ;;  %2217 = vst.msk [vmem:[%s3145_s26 + $0x27] sm:$0x1] %vm518_vm8, %v2186_v2 }
 0x28e   : > { %v2204_v15 = vcombine.high %v2200_v9, %v2200_v9  ;;  %2216 = vst.msk [vmem:[%s3145_s26 + $0x1f] sm:$0x1] %vm518_vm8, %v2203_v11  ;;  %2218 = vst.msk [vmem:[%s3145_s26 + $0x2f] sm:$0x1] %vm518_vm8, %v2200_v9 }
 0x28f   : > { %2219 = vst.msk [vmem:[%s3145_s26 + $0x37] sm:$0x1] %vm518_vm8, %v2202_v10 }
 0x290   : > { %2220 = vst.msk [vmem:[%s3145_s26 + $0x3f] sm:$0x1] %vm518_vm8, %v2204_v15 }
 0x291   : > { %2698 = shalt.err (!%p2695_p4)
}
 0x292   : > { %s2699_s24 = scalar_lea.hbm %s3330_s23, 1024  ;;  %s2703_s26 = scalar_lea.hbm %s3398_s4, 4096 }
 0x293   : > { %p2700_p3 = scmp.ne.s32.totalorder %s3330_s23, %s2699_s24  ;;  %p2704_p2 = scmp.lt.u32.totalorder %s3330_s23, %s3398_s4 }
 0x294   : > { %p2705_p5 = scmp.lt.u32.totalorder %s2703_s26, %s2699_s24  ;;  %p2707_p8 = scmp.lt.u32.totalorder %s2699_s24, %s3330_s23 }
 0x295   : > { %p2701_p6 = pnand %p2700_p3, %p3409_p9 }
 0x296   : > { %p2706_p10 = por %p2705_p5, %p2704_p2 }
 0x297   : > { %p2702_p7 = pneg %p2701_p6 }
 0x298   : > { %p2708_p12 = por %p2707_p8, %p2706_p10 }
 0x29a   : > { %p2709_p0 = pnand %p2708_p12, %p2702_p7 }
 0x29c   : > { %2712 = shalt.err (!%p2709_p0)
}
 0x29d   : > { %s2796_s18 = smov 128   ;;  %s2797_s9 = smov 256  }
 0x29e   : > { %s2798_s30 = smov 8  }
 0x29f   : > { %2565 = dma.vmem_to_hbm [thread:$0]  (%p3409_p9), %s3332_s12, 1024, %s3330_s23, %s2222_s28, %s2796_s18, %s2797_s9, %s2798_s30  }
 0x2a0 PF: > { %p2576_p11 = scmp.ge.s32.totalorder %s2783_s22, 2  ;;  %s2254_s27 = sand.u32 1, %s2755_s15  }
 0x2a1   : > { %p3410_p13 = scmp.ne.s32.totalorder %s3407_s8, 0  ;;  %s2255_s6 = scalar_lea.sflag [#allocation4], %s2254_s27 }
 0x2a3   : > { %p2572_p1 = pnand %p2576_p11, %p3410_p13 }
 0x2a5   : > { %2750 = dma.done.wait (!%p2572_p1), %s2255_s6, 1024  }
 0x2a6   : > { %2752 = vsyncadd (!%p2572_p1), %s2255_s6, 4294966272  ;;  %s20_s22 = sadd.s32 1, %s2783_s22   ;;  %s3411_s5 = sld [smem:[#allocation8_spill]] }
 0x2a7   : > { %p17_p4 = scmp.ge.s32.totalorder %s20_s22, 6   ;;  %s3412_s29 = sld [smem:[#allocation9_spill]] }
 0x2a8   : > { %s3413_s15 = smov %s2759_s16  ;;  %s3414_s16 = smov %s2763_s17 }
 0x2a9   : > { %s3415_s17 = smov %s2902_s10  ;;  %s3416_s18 = smov %s2775_s20 }
 0x2aa   : > { %s3417_s19 = smov %s2779_s21  ;;  %19 = sbr.rel (!%p17_p4) target bundleno = 7 (0x7), region = 87 }
 0x2ac   : > { %s3418_s20 = smov %s3411_s5 }
 0x2ad   : > { %s3419_s21 = smov %s3412_s29 }
 0x2b1   :  { %2260 = vsyncpa [#allocation3], 1 }
 0x2b2   :  { %2262 = vsyncpa [#allocation3 + $0x1], 1 }
 0x2b3   :  { %2263 = vsyncpa [#allocation4], 1 }
 0x2b4   :  { %2265 = vsyncpa [#allocation4 + $0x1], 1 }

</bundles_post_ra>
